<compile_context>
chip_gen: v7x
topology: tpu7x:2x2x1
jax: 0.10.0
libtpu: 0.0.40
codegen_flags: <defaults>
</compile_context>

<pallas_src>
import jax
import jax.numpy as jnp
from jax.experimental import pallas as pl
from jax.experimental.pallas import tpu as pltpu

# KarateClub: 34 nodes, x = identity (34 features), 4 classes
N_NODES = 34
N_FEATS = 34
HIDDEN = 16
N_CLASSES = 4

# Lane-dense padded sizes (padded once, host side).
N_PAD = 128   # nodes
H_PAD = 128   # hidden
C_PAD = 128   # classes (lane-dense output slab)
OUT_ROWS = 40  # ceil(34/8)*8 -> sublane-aligned output/softmax region

NEG = -1e30   # mask value for padded logit columns (finite -> no inf-inf NaNs)


def gcn_kernel(a_ref, xw1_ref, w2_ref, b_ref, out_ref):
    a = a_ref[...]        # (N_PAD, N_PAD) bf16 normalized adjacency (zero outside graph)
    b = b_ref[...]        # (2, C_PAD) f32: row 0 = b1 (zero-padded), row 1 = b2 (NEG-padded)
    b1 = b[0:1, :]
    b2 = b[1:2, :]

    # ---- Layer 1: aggregation of the pre-folded X @ W1 (bf16 MXU, f32 acc) ----
    h1 = jnp.dot(a, xw1_ref[...], preferred_element_type=jnp.float32) + b1
    h1 = jnp.maximum(h1, 0.0)  # ReLU in f32; padded hidden cols stay exactly 0

    # TODO(synk): F.dropout is implemented as identity (eval-mode semantics);
    # training-mode stochastic masking is not applied here.

    # ---- Layer 2: feature transform, then aggregation restricted to the 40
    # sublane-aligned rows covering the 34 real nodes ----
    hw = jnp.dot(h1.astype(jnp.bfloat16), w2_ref[...],
                 preferred_element_type=jnp.float32)
    h2 = jnp.dot(a[:OUT_ROWS, :], hw.astype(jnp.bfloat16),
                 preferred_element_type=jnp.float32) + b2
    # b2 carries NEG in padded class columns, so they cannot perturb max/lse.

    # ---- log_softmax over class dim (lane-dense 128-wide reduce, f32) ----
    m = jnp.max(h2, axis=-1, keepdims=True)
    z = h2 - m
    lse = jnp.log(jnp.sum(jnp.exp(z), axis=-1, keepdims=True))
    out_ref[...] = z - lse


@jax.jit
def gcn_forward_padded(a_p, xw1_p, w2_p, b_p):
    """Runs the single-block Pallas kernel on pre-padded, lane-dense operands."""
    cost = pl.CostEstimate(
        flops=2 * (N_PAD ** 3 + N_PAD ** 3 + OUT_ROWS * N_PAD ** 2),
        transcendentals=OUT_ROWS * (C_PAD + 1),              # exp + log
        bytes_accessed=(3 * N_PAD * N_PAD * 2                # bf16 slabs
                        + 2 * C_PAD * 4                      # bias slab
                        + OUT_ROWS * C_PAD * 4),             # output
    )
    return pl.pallas_call(
        gcn_kernel,
        out_shape=jax.ShapeDtypeStruct((OUT_ROWS, C_PAD), jnp.float32),
        in_specs=[pl.BlockSpec(memory_space=pltpu.MemorySpace.VMEM)] * 4,
        out_specs=pl.BlockSpec(memory_space=pltpu.MemorySpace.VMEM),
        cost_estimate=cost,
    )(a_p, xw1_p, w2_p, b_p)


def prepare_inputs(a_hat, x, w1, b1, w2, b2):
    """One-time host-side prep (hoisted out of the per-call path):
    - fold X @ W1 (X is static; identity for KarateClub),
    - pad everything to lane-dense slabs,
    - cast the MXU operands to bf16,
    - pack b1/b2 into one f32 slab, with b2's padded class cols set to NEG."""
    n = a_hat.shape[0]
    a_p = (jnp.zeros((N_PAD, N_PAD), jnp.float32)
           .at[:n, :n].set(a_hat).astype(jnp.bfloat16))
    xw1 = x @ w1  # exact fold of the first GCNConv matmul
    xw1_p = (jnp.zeros((N_PAD, H_PAD), jnp.float32)
             .at[:xw1.shape[0], :xw1.shape[1]].set(xw1).astype(jnp.bfloat16))
    w2_p = (jnp.zeros((H_PAD, C_PAD), jnp.float32)
            .at[:w2.shape[0], :w2.shape[1]].set(w2).astype(jnp.bfloat16))
    b_p = jnp.zeros((2, C_PAD), jnp.float32)
    b_p = b_p.at[0, : b1.shape[0]].set(b1)          # b1: zero-padded hidden cols
    b_p = b_p.at[1, :].set(NEG)                     # b2: NEG in padded class cols
    b_p = b_p.at[1, : b2.shape[0]].set(b2)
    return a_p, xw1_p, w2_p, b_p


def normalized_adjacency(edge_index, num_nodes):
    """Dense D^{-1/2} (A + I) D^{-1/2} from a [2, E] edge_index (glue, plain JAX)."""
    row, col = edge_index[0], edge_index[1]
    a = jnp.zeros((num_nodes, num_nodes), jnp.float32)
    a = a.at[row, col].set(1.0)
    idx = jnp.arange(num_nodes)
    a = a.at[idx, idx].set(1.0)  # add self-loops
    deg = a.sum(axis=1)
    dinv = jnp.where(deg > 0, 1.0 / jnp.sqrt(deg), 0.0)
    return dinv[:, None] * a * dinv[None, :]


def glorot(key, shape):
    limit = jnp.sqrt(6.0 / (shape[0] + shape[1]))
    return jax.random.uniform(key, shape, jnp.float32, -limit, limit)


if __name__ == "__main__":
    key = jax.random.PRNGKey(0)
    k_e1, k_e2, k_w1, k_w2 = jax.random.split(key, 4)

    # Deterministic synthetic graph at KarateClub scale: 34 nodes, 78 undirected
    # edges (156 directed), node features = identity (as in KarateClub).
    n_edges = 78
    src = jax.random.randint(k_e1, (n_edges,), 0, N_NODES)
    dst = jax.random.randint(k_e2, (n_edges,), 0, N_NODES)
    edge_index = jnp.concatenate(
        [jnp.stack([src, dst]), jnp.stack([dst, src])], axis=1
    )  # [2, 156]
    x = jnp.eye(N_NODES, N_FEATS, dtype=jnp.float32)

    # Deterministic parameters (GCNConv: glorot weights, zero bias).
    w1 = glorot(k_w1, (N_FEATS, HIDDEN))
    b1 = jnp.zeros((HIDDEN,), jnp.float32)
    w2 = glorot(k_w2, (HIDDEN, N_CLASSES))
    b2 = jnp.zeros((N_CLASSES,), jnp.float32)

    a_hat = normalized_adjacency(edge_index, N_NODES)

    # One-time fold/pad/cast (not in the per-call hot path).
    padded = prepare_inputs(a_hat, x, w1, b1, w2, b2)
    padded = jax.block_until_ready(padded)

    out_full = gcn_forward_padded(*padded)
    out_full = jax.block_until_ready(out_full)
    out = out_full[:N_NODES, :N_CLASSES]

    # Sanity: log_softmax rows should sum (in prob space) to ~1 over the 4
    # real classes (padded columns were masked to NEG before the softmax, so
    # their probability is exactly 0 regardless of the bf16 matmul precision).
    row_prob = jnp.exp(out).sum(axis=1)
    assert out.shape == (N_NODES, N_CLASSES)
    assert bool(jnp.all(jnp.abs(row_prob - 1.0) < 1e-4))

    print("KERNEL_OK")
</pallas_src>

<mosaic_0001>
module attributes {stable_mosaic.version = 11 : i64} {
  func.func @gcn_kernel(%arg0: memref<128x128xbf16, #tpu.memory_space<vmem>>, %arg1: memref<128x128xbf16, #tpu.memory_space<vmem>>, %arg2: memref<128x128xbf16, #tpu.memory_space<vmem>>, %arg3: memref<2x128xf32, #tpu.memory_space<vmem>>, %arg4: memref<40x128xf32, #tpu.memory_space<vmem>>) attributes {dimension_semantics = [], scalar_prefetch = 0 : i64, scratch_operands = 0 : i64, tpu.core_type = #tpu.core_type<tc>} {
    %c0 = arith.constant 0 : index
    %c0_0 = arith.constant 0 : index
    %0 = vector.load %arg0[%c0, %c0_0] : memref<128x128xbf16, #tpu.memory_space<vmem>>, vector<128x128xbf16>
    %c0_1 = arith.constant 0 : index
    %c0_2 = arith.constant 0 : index
    %1 = vector.load %arg3[%c0_1, %c0_2] : memref<2x128xf32, #tpu.memory_space<vmem>>, vector<2x128xf32>
    %2 = vector.extract_strided_slice %1 {offsets = [0, 0], sizes = [1, 128], strides = [1, 1]} : vector<2x128xf32> to vector<1x128xf32>
    %3 = vector.extract_strided_slice %1 {offsets = [1, 0], sizes = [1, 128], strides = [1, 1]} : vector<2x128xf32> to vector<1x128xf32>
    %c0_3 = arith.constant 0 : index
    %c0_4 = arith.constant 0 : index
    %4 = vector.load %arg1[%c0_3, %c0_4] : memref<128x128xbf16, #tpu.memory_space<vmem>>, vector<128x128xbf16>
    %cst = arith.constant dense<0.000000e+00> : vector<128x128xf32>
    %5 = tpu.matmul %0, %4, %cst {dimension_numbers = #tpu.dot_dimension_numbers<[1], [0], [0], [1], [0, 0, 1, 1], [], []>} : vector<128x128xbf16>, vector<128x128xbf16>, vector<128x128xf32> -> vector<128x128xf32>
    %6 = vector.broadcast %2 : vector<1x128xf32> to vector<128x128xf32>
    %7 = arith.addf %5, %6 : vector<128x128xf32>
    %cst_5 = arith.constant 0.000000e+00 : f32
    %8 = vector.broadcast %cst_5 : f32 to vector<128x128xf32>
    %9 = arith.maximumf %7, %8 : vector<128x128xf32>
    %10 = arith.truncf %9 : vector<128x128xf32> to vector<128x128xbf16>
    %c0_6 = arith.constant 0 : index
    %c0_7 = arith.constant 0 : index
    %11 = vector.load %arg2[%c0_6, %c0_7] : memref<128x128xbf16, #tpu.memory_space<vmem>>, vector<128x128xbf16>
    %cst_8 = arith.constant dense<0.000000e+00> : vector<128x128xf32>
    %12 = tpu.matmul %10, %11, %cst_8 {dimension_numbers = #tpu.dot_dimension_numbers<[1], [0], [0], [1], [0, 0, 1, 1], [], []>} : vector<128x128xbf16>, vector<128x128xbf16>, vector<128x128xf32> -> vector<128x128xf32>
    %13 = vector.extract_strided_slice %0 {offsets = [0, 0], sizes = [40, 128], strides = [1, 1]} : vector<128x128xbf16> to vector<40x128xbf16>
    %14 = arith.truncf %12 : vector<128x128xf32> to vector<128x128xbf16>
    %cst_9 = arith.constant dense<0.000000e+00> : vector<40x128xf32>
    %15 = tpu.matmul %13, %14, %cst_9 {dimension_numbers = #tpu.dot_dimension_numbers<[1], [0], [0], [1], [0, 0, 1, 1], [], []>} : vector<40x128xbf16>, vector<128x128xbf16>, vector<40x128xf32> -> vector<40x128xf32>
    %16 = vector.broadcast %3 : vector<1x128xf32> to vector<40x128xf32>
    %17 = arith.addf %15, %16 : vector<40x128xf32>
    %cst_10 = arith.constant dense<0xFF800000> : vector<40xf32>
    %18 = vector.multi_reduction <maximumf>, %17, %cst_10 [1] : vector<40x128xf32> to vector<40xf32>
    %19 = vector.shape_cast %18 : vector<40xf32> to vector<40x1xf32>
    %20 = vector.broadcast %19 : vector<40x1xf32> to vector<40x128xf32>
    %21 = arith.subf %17, %20 : vector<40x128xf32>
    %22 = math.exp %21 : vector<40x128xf32>
    %cst_11 = arith.constant dense<0.000000e+00> : vector<40xf32>
    %23 = vector.multi_reduction <add>, %22, %cst_11 [1] : vector<40x128xf32> to vector<40xf32>
    %24 = vector.shape_cast %23 : vector<40xf32> to vector<40x1xf32>
    %25 = math.log %24 : vector<40x1xf32>
    %26 = vector.broadcast %25 : vector<40x1xf32> to vector<40x128xf32>
    %27 = arith.subf %21, %26 : vector<40x128xf32>
    %c0_12 = arith.constant 0 : index
    %c0_13 = arith.constant 0 : index
    %28 = vector.load %arg4[%c0_12, %c0_13] : memref<40x128xf32, #tpu.memory_space<vmem>>, vector<40x128xf32>
    tpu.vector_store %arg4[%c0_12, %c0_13], %27 {strides = array<i32>} : memref<40x128xf32, #tpu.memory_space<vmem>>, vector<40x128xf32>,
    return
  }
}

</mosaic_0001>

<bundles_post_ra>
// kernel: gcn_forward_padded.1
= control target key start
LH: loop header
LB: loop body
LE: loop exit
PB: predicated region body
PF: predicated region fallthrough
CT: control target
= control target key end

     0   :  { %9 = vsyncpa [#allocation3], 0  ;;  %s1069_s0 = inlined_call_operand.hbm [shape: bf16[128,128], index: 0, kind: input, shape index: {}]   ;;  %s1070_s1 = inlined_call_operand.hbm [shape: bf16[128,128], index: 1, kind: input, shape index: {}]   ;;  %s1071_s2 = inlined_call_operand.hbm [shape: bf16[128,128], index: 2, kind: input, shape index: {}]   ;;  %s1072_s3 = inlined_call_operand.vmem [shape: f32[2,128], index: 3, kind: input, shape index: {}]   ;;  %s1073_s4 = inlined_call_operand.hbm [shape: f32[40,128], index: 4, kind: output, shape index: {}]  }
   0x1   :  { %10 = vsyncpa [#allocation6], 0 }
   0x2   :  { %11 = vsyncpa [#allocation4], 0  ;;  %s943_s15 = smov [#allocation5]   ;;  %s944_s17 = smov [#allocation2]  }
   0x3   :  { %s29_s16 = sshll.u32 %s943_s15, 4  ;;  %s17_s18 = sshll.u32 %s944_s17, 4  ;;  %s30_s16 = int_to_ptr.vmem [resolvable:$true] %s29_s16  ;;  %s978_s18 = int_to_ptr.vmem [resolvable:$true] %s17_s18 }
   0x4   :  { %s849_s21 = scalar_lea.hbm %s1070_s1, 1024 }
   0x5   :  { %p850_p0 = scmp.ne.s32.totalorder %s1070_s1, %s849_s21  ;;  %p853_p1 = scmp.lt.u32.totalorder %s849_s21, %s1070_s1 }
   0x7   :  { %p855_p2 = pnand %p853_p1, %p850_p0 }
   0x9   :  { %858 = shalt.err (!%p855_p2)
}
   0xa   :  { %s859_s26 = scalar_lea.vmem %s30_s16, 1024  ;;  %p864_p4 = scmp.lt.s32.totalorder %s30_s16, %s30_s16 }
   0xb   :  { %p860_p3 = scmp.ne.s32.totalorder %s30_s16, %s859_s26  ;;  %p865_p5 = scmp.lt.s32.totalorder %s859_s26, %s859_s26 }
   0xd   :  { %p866_p6 = por %p865_p5, %p864_p4 }
   0xf   :  { %p867_p7 = pnand %p866_p6, %p860_p3 }
  0x11   :  { %870 = shalt.err (!%p867_p7)
}
  0x12   :  { %s945_s27 = smov 64   ;;  %s946_s28 = smov 4  }
  0x13   :  { %35 = dma.hbm_to_vmem [thread:$0]  %s1070_s1, 1024, %s30_s16, [#allocation6], %s945_s27, %s945_s27, %s946_s28  }
  0x14   :  { %s871_s7 = scalar_lea.hbm %s1069_s0, 1024 }
  0x15   :  { %p872_p8 = scmp.ne.s32.totalorder %s1069_s0, %s871_s7  ;;  %p875_p9 = scmp.lt.u32.totalorder %s871_s7, %s1069_s0 }
  0x17   :  { %p877_p10 = pnand %p875_p9, %p872_p8 }
  0x19   :  { %880 = shalt.err (!%p877_p10)
}
  0x1a   :  { %s881_s12 = scalar_lea.vmem %s978_s18, 1024  ;;  %p886_p12 = scmp.lt.s32.totalorder %s978_s18, %s978_s18 }
  0x1b   :  { %p882_p11 = scmp.ne.s32.totalorder %s978_s18, %s881_s12  ;;  %p887_p13 = scmp.lt.s32.totalorder %s881_s12, %s881_s12 }
  0x1d   :  { %p888_p0 = por %p887_p13, %p886_p12 }
  0x1f   :  { %p889_p1 = pnand %p888_p0, %p882_p11 }
  0x21   :  { %892 = shalt.err (!%p889_p1)
}
  0x22   :  { %23 = dma.hbm_to_vmem [thread:$0]  %s1069_s0, 1024, %s978_s18, [#allocation3], %s945_s27, %s945_s27, %s946_s28  }
  0x23   :  { %s947_s14 = smov [#allocation7]   ;;  %s893_s19 = scalar_lea.hbm %s1071_s2, 1024 }
  0x24   :  { %s41_s15 = sshll.u32 %s947_s14, 4  ;;  %p894_p2 = scmp.ne.s32.totalorder %s1071_s2, %s893_s19  ;;  %s42_s15 = int_to_ptr.vmem [resolvable:$true] %s41_s15 }
  0x25   :  { %p897_p3 = scmp.lt.u32.totalorder %s893_s19, %s1071_s2 }
  0x27   :  { %p899_p4 = pnand %p897_p3, %p894_p2 }
  0x29   :  { %902 = shalt.err (!%p899_p4)
}
  0x2a   :  { %s903_s24 = scalar_lea.vmem %s42_s15, 1024  ;;  %p908_p6 = scmp.lt.s32.totalorder %s42_s15, %s42_s15 }
  0x2b   :  { %p904_p5 = scmp.ne.s32.totalorder %s42_s15, %s903_s24  ;;  %p909_p7 = scmp.lt.s32.totalorder %s903_s24, %s903_s24 }
  0x2d   :  { %p910_p8 = por %p909_p7, %p908_p6 }
  0x2f   :  { %p911_p9 = pnand %p910_p8, %p904_p5 }
  0x31   :  { %914 = shalt.err (!%p911_p9)
}
  0x32   :  { %47 = dma.hbm_to_vmem [thread:$0]  %s1071_s2, 1024, %s42_s15, [#allocation6], %s945_s27, %s945_s27, %s946_s28  }
  0x33   :  { %937 = dma.done.wait [#allocation3], 1024  }
  0x34   :  { %938 = vsyncadd [#allocation3], 4294966272 }
  0x35   :  { %939 = dma.done.wait [#allocation6], 2048  }
  0x36   :  { %940 = vsyncadd [#allocation6], 4294965248  ;;  %v804_v0 = vld [vmem:[#allocation5] sm:$0xff]   ;;  %v805_v1 = vld [vmem:[#allocation5 + $0x8] sm:$0xff]   ;;  %v93_v26 = vlaneseq  ;;  %vm949_vm0 = vmmov 0  }
  0x37   :  { %686 = vmatprep.subr.bf16.mxu0 %v804_v0  ;;  %v806_v2 = vld [vmem:[#allocation5 + $0x10] sm:$0xff]   ;;  %v807_v3 = vld [vmem:[#allocation5 + $0x18] sm:$0xff]   ;;  %v1030_v4 = vld [vmem:[#allocation2] sm:$0xff]  }
  0x38   :  { %687 = vmatpush3.bf16.msra.mxu0 %v804_v0  ;;  %702 = vmatprep.mubr.bf16.mxu0 %v1030_v4  ;;  %v808_v5 = vld [vmem:[#allocation5 + $0x20] sm:$0xff]   ;;  %v809_v6 = vld [vmem:[#allocation5 + $0x28] sm:$0xff]   ;;  %v810_v9 = vld [vmem:[#allocation5 + $0x30] sm:$0xff]   ;;  %v1039_v27 = vshrl.u32 %v93_v26, 7  ;;  %v948_v26 = vmov 0.0  }
  0x39   :  { %688 = vmatprep.subr.bf16.mxu0 %v805_v1  ;;  %v820_v7 = vld [vmem:[#allocation7] sm:$0xff]   ;;  %v821_v8 = vld [vmem:[#allocation7 + $0x8] sm:$0xff]   ;;  %v822_v10 = vld [vmem:[#allocation7 + $0x10] sm:$0xff]  }
  0x3a   :  { %718 = vmatprep.subr.bf16.mxu1 %v820_v7  ;;  %v811_v11 = vld [vmem:[#allocation5 + $0x38] sm:$0xff]   ;;  %v1033_v13 = vld [vmem:[#allocation2 + $0x10] sm:$0xf]  ;;  %v65_v14 = vld [vmem:[#allocation2 + $0x14] sm:$0xf]  ;;  %v95_v28 = vsub.s32 0, %v1039_v27 }
  0x3b   :  { %719 = vmatpush3.bf16.msra.mxu1 %v820_v7  ;;  %v823_v12 = vld [vmem:[#allocation7 + $0x18] sm:$0xff]   ;;  %v824_v15 = vld [vmem:[#allocation7 + $0x20] sm:$0xff]   ;;  %v1035_v16 = vld [vmem:[#allocation2 + $0x8] sm:$0xff]   ;;  %v620_v17 = vcombine.low %v1033_v13, %v65_v14 }
  0x3c   :  { %689 = vmatpush3.bf16.msra.mxu0 %v805_v1  ;;  %720 = vmatprep.subr.bf16.mxu1 %v821_v8  ;;  %v825_v18 = vld [vmem:[#allocation7 + $0x28] sm:$0xff]   ;;  %v815_v19 = vld [vmem:[#allocation2 + $0x18] sm:$0xff]   ;;  %v816_v20 = vld [vmem:[#allocation2 + $0x20] sm:$0xff]  }
  0x3d   :  { %690 = vmatprep.subr.bf16.mxu0 %v806_v2  ;;  %v817_v21 = vld [vmem:[#allocation2 + $0x28] sm:$0xff]   ;;  %v818_v22 = vld [vmem:[#allocation2 + $0x30] sm:$0xff]   ;;  %v819_v23 = vld [vmem:[#allocation2 + $0x38] sm:$0xff]  }
  0x3e   :  { %v826_v24 = vld [vmem:[#allocation7 + $0x30] sm:$0xff]   ;;  %v827_v25 = vld [vmem:[#allocation7 + $0x38] sm:$0xff]   ;;  %v1045_v29 = vld [vmem:[%s1072_s3] sm:$0x3]  ;;  %s950_s3 = smov [#allocation8]  }
  0x3f   :  { %721 = vmatpush3.bf16.msra.mxu1 %v821_v8  ;;  %v96_v30 = vrot.slane %v1045_v29, %v95_v28  ;;  %s605_s26 = sshll.u32 %s950_s3, 4  ;;  %s606_s26 = int_to_ptr.vmem [resolvable:$true] %s605_s26 }
  0x40   :  { %691 = vmatpush3.bf16.msra.mxu0 %v806_v2  ;;  %722 = vmatprep.subr.bf16.mxu1 %v822_v10  ;;  %s915_s27 = scalar_lea.vmem %s606_s26, 640  ;;  %p920_p11 = scmp.lt.s32.totalorder %s606_s26, %s606_s26 }
  0x41   :  { %692 = vmatprep.subr.bf16.mxu0 %v807_v3  ;;  %p916_p10 = scmp.ne.s32.totalorder %s606_s26, %s915_s27  ;;  %p921_p12 = scmp.lt.s32.totalorder %s915_s27, %s915_s27 }
  0x43   :  { %723 = vmatpush3.bf16.msra.mxu1 %v822_v10  ;;  %p922_p13 = por %p921_p12, %p920_p11 }
  0x44   :  { %693 = vmatpush3.bf16.msra.mxu0 %v807_v3  ;;  %724 = vmatprep.subr.bf16.mxu1 %v823_v12 }
  0x45   :  { %694 = vmatprep.subr.bf16.mxu0 %v808_v5  ;;  %p923_p0 = pnand %p922_p13, %p916_p10 }
  0x47   :  { %725 = vmatpush3.bf16.msra.mxu1 %v823_v12 }
  0x48   :  { %695 = vmatpush3.bf16.msra.mxu0 %v808_v5  ;;  %726 = vmatprep.subr.bf16.mxu1 %v824_v15 }
  0x49   :  { %696 = vmatprep.subr.bf16.mxu0 %v809_v6 }
  0x4b   :  { %727 = vmatpush3.bf16.msra.mxu1 %v824_v15 }
  0x4c   :  { %697 = vmatpush3.bf16.msra.mxu0 %v809_v6  ;;  %728 = vmatprep.subr.bf16.mxu1 %v825_v18 }
  0x4d   :  { %698 = vmatprep.subr.bf16.mxu0 %v810_v9 }
  0x4f   :  { %729 = vmatpush3.bf16.msra.mxu1 %v825_v18 }
  0x50   :  { %699 = vmatpush3.bf16.msra.mxu0 %v810_v9  ;;  %730 = vmatprep.subr.bf16.mxu1 %v826_v24 }
  0x51   :  { %700 = vmatprep.subr.bf16.mxu0 %v811_v11 }
  0x53   :  { %731 = vmatpush3.bf16.msra.mxu1 %v826_v24 }
  0x54   :  { %701 = vmatpush3.bf16.msra.mxu0 %v811_v11  ;;  %732 = vmatprep.subr.bf16.mxu1 %v827_v25 }
  0x55   :  { %750 = vmatprep.subr.bf16.mxu0 %v948_v26 }
  0x57   :  { %703 = vmatmul.mubr.bf16.vlgmr.msra.gmra.mrb[0].mxu0 %v1035_v16  ;;  %733 = vmatpush3.bf16.msra.mxu1 %v827_v25 }
  0x58   :  { %706 = vmatprep.mubr.bf16.mxu0 %v620_v17  ;;  %778 = vmatprep.subr.bf16.mxu1 %v948_v26 }
  0x5f   :  { %707 = vmatmul.mubr.bf16.gmra.mrb[4].mxu0 %v815_v19 }
  0x60   :  { %710 = vmatprep.mubr.bf16.mxu0 %v816_v20 }
  0x67   :  { %711 = vmatmul.mubr.bf16.gmra.mrb[8].mxu0 %v817_v21 }
  0x68   :  { %714 = vmatprep.mubr.bf16.mxu0 %v818_v22 }
  0x6f   :  { %715 = vmatmul.mubr.bf16.gmra.mrb[12].mxu0 %v819_v23 }
  0x70   :  { %766 = vmatprep.mubr.msk.bf16.mxu0 %vm949_vm0, %v948_v26 }
 0x12a   :  { %v704_v31 = vpop.f32.mrb[0].mxu0 }
 0x12b   :  { %v236_v32 = vadd.f32 %v704_v31, %v96_v30  ;;  %v227_v33 = vpop.f32.mrb[1].mxu0 }
 0x12c   :  { %v228_v34 = vadd.f32 %v227_v33, %v96_v30  ;;  %v705_v35 = vpop.f32.mrb[2].mxu0 }
 0x12d   :  { %v239_v36 = vadd.f32 %v705_v35, %v96_v30  ;;  %v230_v37 = vpop.f32.mrb[3].mxu0  ;;  %v292_v39 = vmax.f32 %v236_v32, 0.0 }
 0x12e   :  { %v231_v38 = vadd.f32 %v230_v37, %v96_v30  ;;  %v290_v41 = vmax.f32 %v228_v34, 0.0 }
 0x12f   :  { %v293_v40 = vmax.f32 %v239_v36, 0.0 }
 0x130   :  { %v291_v42 = vmax.f32 %v231_v38, 0.0 }
 0x131   :  { %v307_v43 = vpack.c.bf16 %v293_v40, %v292_v39 }
 0x132   :  { %v708_v44 = vpop.f32.mrb[4].mxu0  ;;  %v306_v45 = vpack.c.bf16 %v291_v42, %v290_v41 }
 0x133   :  { %v252_v46 = vadd.f32 %v708_v44, %v96_v30  ;;  %v243_v47 = vpop.f32.mrb[5].mxu0 }
 0x134   :  { %v244_v48 = vadd.f32 %v243_v47, %v96_v30  ;;  %v709_v49 = vpop.f32.mrb[6].mxu0  ;;  %734 = vmatprep.mubr.bf16.mxu1 %v306_v45 }
 0x135   :  { %v255_v50 = vadd.f32 %v709_v49, %v96_v30  ;;  %v246_v51 = vpop.f32.mrb[7].mxu0  ;;  %735 = vmatmul.mubr.bf16.vlgmr.msra.gmra.mrb[0].mxu1 %v307_v43  ;;  %v296_v53 = vmax.f32 %v252_v46, 0.0 }
 0x136   :  { %v247_v52 = vadd.f32 %v246_v51, %v96_v30  ;;  %v294_v55 = vmax.f32 %v244_v48, 0.0 }
 0x137   :  { %v297_v54 = vmax.f32 %v255_v50, 0.0 }
 0x138   :  { %v295_v56 = vmax.f32 %v247_v52, 0.0 }
 0x139   :  { %v309_v57 = vpack.c.bf16 %v297_v54, %v296_v53  ;;  %v642_v53 = vcombine.low %v1033_v13, %v1033_v13  ;;  %v485_v54 = vsub.s32 1, %v1039_v27 }
 0x13a   :  { %v308_v58 = vpack.c.bf16 %v295_v56, %v294_v55  ;;  %v712_v59 = vpop.f32.mrb[8].mxu0 }
 0x13b   :  { %v268_v60 = vadd.f32 %v712_v59, %v96_v30  ;;  %v259_v61 = vpop.f32.mrb[9].mxu0  ;;  %v486_v55 = vrot.slane %v1045_v29, %v485_v54 }
 0x13c   :  { %v260_v62 = vadd.f32 %v259_v61, %v96_v30  ;;  %v713_v63 = vpop.f32.mrb[10].mxu0  ;;  %738 = vmatprep.mubr.bf16.mxu1 %v308_v58 }
 0x13d   :  { %v271_v0 = vadd.f32 %v713_v63, %v96_v30  ;;  %v262_v1 = vpop.f32.mrb[11].mxu0  ;;  %739 = vmatmul.mubr.bf16.gmra.mrb[4].mxu1 %v309_v57  ;;  %v300_v3 = vmax.f32 %v268_v60, 0.0 }
 0x13e   :  { %v263_v2 = vadd.f32 %v262_v1, %v96_v30  ;;  %v298_v6 = vmax.f32 %v260_v62, 0.0 }
 0x13f   :  { %v301_v5 = vmax.f32 %v271_v0, 0.0 }
 0x140   :  { %v299_v7 = vmax.f32 %v263_v2, 0.0 }
 0x141   :  { %v311_v8 = vpack.c.bf16 %v301_v5, %v300_v3 }
 0x142   :  { %v310_v9 = vpack.c.bf16 %v299_v7, %v298_v6  ;;  %v716_v10 = vpop.f32.mrb[12].mxu0 }
 0x143   :  { %v284_v11 = vadd.f32 %v716_v10, %v96_v30  ;;  %v275_v12 = vpop.f32.mrb[13].mxu0 }
 0x144   :  { %v276_v14 = vadd.f32 %v275_v12, %v96_v30  ;;  %v717_v15 = vpop.f32.mrb[14].mxu0  ;;  %742 = vmatprep.mubr.bf16.mxu1 %v310_v9 }
 0x145   :  { %v287_v17 = vadd.f32 %v717_v15, %v96_v30  ;;  %v278_v18 = vpop.f32.mrb[15].mxu0  ;;  %743 = vmatmul.mubr.bf16.gmra.mrb[8].mxu1 %v311_v8  ;;  %v304_v20 = vmax.f32 %v284_v11, 0.0 }
 0x146   :  { %v279_v19 = vadd.f32 %v278_v18, %v96_v30  ;;  %v302_v22 = vmax.f32 %v276_v14, 0.0 }
 0x147   :  { %v305_v21 = vmax.f32 %v287_v17, 0.0 }
 0x148   :  { %v303_v23 = vmax.f32 %v279_v19, 0.0 }
 0x149   :  { %v313_v24 = vpack.c.bf16 %v305_v21, %v304_v20 }
 0x14a   :  { %v312_v25 = vpack.c.bf16 %v303_v23, %v302_v22 }
 0x14c   :  { %746 = vmatprep.mubr.bf16.mxu1 %v312_v25 }
 0x14d   :  { %747 = vmatmul.mubr.bf16.gmra.mrb[12].mxu1 %v313_v24 }
 0x14e   :  { %770 = vmatprep.mubr.msk.bf16.mxu1 %vm949_vm0, %v948_v26 }
 0x208   :  { %v736_v28 = vpop.f32.mrb[0].mxu1 }
 0x209   :  { %v412_v31 = vpop.f32.mrb[1].mxu1 }
 0x20a   :  { %v737_v32 = vpop.f32.mrb[2].mxu1 }
 0x20b   :  { %v476_v30 = vpack.c.bf16 %v737_v32, %v736_v28  ;;  %v415_v33 = vpop.f32.mrb[3].mxu1 }
 0x20c   :  { %v475_v34 = vpack.c.bf16 %v415_v33, %v412_v31 }
 0x20e   :  { %751 = vmatpush3.bf16.msra.mxu0 %v475_v34  ;;  %786 = vmatpush3.bf16.msra.mxu1 %v475_v34 }
 0x20f   :  { %752 = vmatprep.subr.bf16.mxu0 %v948_v26  ;;  %779 = vmatprep.subr.bf16.mxu1 %v948_v26 }
 0x210   :  { %v740_v35 = vpop.f32.mrb[4].mxu1 }
 0x211   :  { %v428_v36 = vpop.f32.mrb[5].mxu1 }
 0x212   :  { %v741_v37 = vpop.f32.mrb[6].mxu1  ;;  %753 = vmatpush3.bf16.msra.mxu0 %v476_v30  ;;  %787 = vmatpush3.bf16.msra.mxu1 %v476_v30 }
 0x213   :  { %v478_v38 = vpack.c.bf16 %v741_v37, %v740_v35  ;;  %v431_v39 = vpop.f32.mrb[7].mxu1  ;;  %754 = vmatprep.subr.bf16.mxu0 %v948_v26  ;;  %780 = vmatprep.subr.bf16.mxu1 %v948_v26 }
 0x214   :  { %v477_v40 = vpack.c.bf16 %v431_v39, %v428_v36 }
 0x216   :  { %755 = vmatpush3.bf16.msra.mxu0 %v477_v40  ;;  %788 = vmatpush3.bf16.msra.mxu1 %v477_v40 }
 0x217   :  { %756 = vmatprep.subr.bf16.mxu0 %v948_v26  ;;  %781 = vmatprep.subr.bf16.mxu1 %v948_v26 }
 0x218   :  { %v744_v41 = vpop.f32.mrb[8].mxu1 }
 0x219   :  { %v444_v42 = vpop.f32.mrb[9].mxu1 }
 0x21a   :  { %v745_v43 = vpop.f32.mrb[10].mxu1  ;;  %757 = vmatpush3.bf16.msra.mxu0 %v478_v38  ;;  %789 = vmatpush3.bf16.msra.mxu1 %v478_v38 }
 0x21b   :  { %v480_v44 = vpack.c.bf16 %v745_v43, %v744_v41  ;;  %v447_v45 = vpop.f32.mrb[11].mxu1  ;;  %758 = vmatprep.subr.bf16.mxu0 %v948_v26  ;;  %782 = vmatprep.subr.bf16.mxu1 %v948_v26 }
 0x21c   :  { %v479_v46 = vpack.c.bf16 %v447_v45, %v444_v42 }
 0x21e   :  { %759 = vmatpush3.bf16.msra.mxu0 %v479_v46  ;;  %790 = vmatpush3.bf16.msra.mxu1 %v479_v46 }
 0x21f   :  { %760 = vmatprep.subr.bf16.mxu0 %v948_v26  ;;  %783 = vmatprep.subr.bf16.mxu1 %v948_v26 }
 0x220   :  { %v748_v47 = vpop.f32.mrb[12].mxu1 }
 0x221   :  { %v460_v48 = vpop.f32.mrb[13].mxu1 }
 0x222   :  { %v749_v49 = vpop.f32.mrb[14].mxu1  ;;  %761 = vmatpush3.bf16.msra.mxu0 %v480_v44  ;;  %791 = vmatpush3.bf16.msra.mxu1 %v480_v44 }
 0x223   :  { %v482_v50 = vpack.c.bf16 %v749_v49, %v748_v47  ;;  %v463_v51 = vpop.f32.mrb[15].mxu1  ;;  %762 = vmatprep.subr.bf16.mxu0 %v948_v26  ;;  %784 = vmatprep.subr.bf16.mxu1 %v948_v26 }
 0x224   :  { %v481_v52 = vpack.c.bf16 %v463_v51, %v460_v48 }
 0x226   :  { %763 = vmatpush3.bf16.msra.mxu0 %v481_v52  ;;  %792 = vmatpush3.bf16.msra.mxu1 %v481_v52 }
 0x227   :  { %764 = vmatprep.subr.bf16.mxu0 %v948_v26  ;;  %785 = vmatprep.subr.bf16.mxu1 %v948_v26 }
 0x22a   :  { %765 = vmatpush3.bf16.msra.mxu0 %v482_v50  ;;  %793 = vmatpush3.bf16.msra.mxu1 %v482_v50 }
 0x22d   :  { %767 = vmatmul.mubr.bf16.vlgmr.msra.gmra.mrb[16].mxu0 %v1030_v4  ;;  %771 = vmatmul.mubr.bf16.vlgmr.msra.gmra.mrb[16].mxu1 %v1035_v16 }
 0x22e   :  { %774 = vmatprep.mubr.msk.bf16.mxu1 %vm949_vm0, %v948_v26 }
 0x235   :  { %775 = vmatmul.mubr.bf16.gmra.mrb[20].mxu1 %v642_v53 }
 0x300   :  { %v523_v56 = vpop.f32.mrb[16].mxu0  ;;  %v531_v57 = vpop.f32.mrb[16].mxu1 }
 0x301   :  { %v524_v58 = vadd.f32 %v523_v56, %v486_v55  ;;  %v532_v59 = vadd.f32 %v531_v57, %v486_v55  ;;  %v768_v60 = vpop.f32.mrb[17].mxu0  ;;  %v772_v61 = vpop.f32.mrb[17].mxu1 }
 0x302   :  { %v526_v62 = vpop.f32.mrb[18].mxu0  ;;  %v534_v4 = vpop.f32.mrb[18].mxu1 }
 0x303   :  { %549 = vmax.xlane.f32.xlu1 %v532_v59  ;;  %v773_v16 = vpop.f32.mrb[19].mxu1  ;;  %545 = vmax.xlane.f32.xlu0 %v524_v58  ;;  %v769_v63 = vpop.f32.mrb[19].mxu0  ;;  %v527_v0 = vadd.f32 %v526_v62, %v486_v55  ;;  %v535_v1 = vadd.f32 %v534_v4, %v486_v55 }
 0x307   :  { %551 = vmax.xlane.f32.xlu1 %v535_v1  ;;  %547 = vmax.xlane.f32.xlu0 %v527_v0 }
 0x308   :  { %v539_v13 = vpop.f32.mrb[20].mxu1 }
 0x309   :  { %v540_v27 = vadd.f32 %v539_v13, %v486_v55  ;;  %v776_v2 = vpop.f32.mrb[21].mxu1 }
 0x30a   :  { %v542_v29 = vpop.f32.mrb[22].mxu1 }
 0x30b   :  { %v777_v3 = vpop.f32.mrb[23].mxu1  ;;  %553 = vmax.xlane.f32.xlu0 %v540_v27 }
 0x390   :  { %v550_v5 = vpop.xlane.xlu1 %549  ;;  %v546_v6 = vpop.xlane.xlu0 %545 }
 0x391   :  { %v557_v7 = vsub.f32 %v532_v59, %v550_v5  ;;  %v555_v8 = vsub.f32 %v524_v58, %v546_v6 }
 0x393   :  { %v560_v9 = vmul.f32 1.442695, %v555_v8  ;;  %v564_v12 = vmul.f32 1.442695, %v557_v7 }
 0x394   :  { %v552_v10 = vpop.xlane.xlu1 %551  ;;  %v548_v11 = vpop.xlane.xlu0 %547 }
 0x395   :  { %v556_v14 = vsub.f32 %v527_v0, %v548_v11  ;;  %829 = vpow2.f32 %v560_v9  ;;  %v558_v15 = vsub.f32 %v535_v1, %v552_v10 }
 0x396   :  { %831 = vpow2.f32 %v564_v12 }
 0x397   :  { %v562_v17 = vmul.f32 1.442695, %v556_v14  ;;  %v566_v20 = vmul.f32 1.442695, %v558_v15 }
 0x398   :  { %v554_v18 = vpop.xlane.xlu0 %553 }
 0x399   :  { %v559_v19 = vsub.f32 %v540_v27, %v554_v18  ;;  %833 = vpow2.f32 %v562_v17 }
 0x39b   :  { %v568_v21 = vmul.f32 1.442695, %v559_v19 }
 0x39d   :  { %835 = vpow2.f32 %v568_v21 }
 0x39e   :  { %837 = vpow2.f32 %v566_v20 }
 0x39f   :  { %v830_v22 = vpop.eup %829 }
 0x3a0   :  { %570 = vadd.xlane.f32.xlu1 %v830_v22  ;;  %v832_v23 = vpop.eup %831 }
 0x3a3   :  { %v834_v24 = vpop.eup %833 }
 0x3a4   :  { %574 = vadd.xlane.f32.xlu1 %v832_v23  ;;  %572 = vadd.xlane.f32.xlu0 %v834_v24 }
 0x3a7   :  { %v836_v25 = vpop.eup %835 }
 0x3a8   :  { %v838_v26 = vpop.eup %837  ;;  %578 = vadd.xlane.f32.xlu1 %v836_v25 }
 0x3a9   :  { %576 = vadd.xlane.f32.xlu0 %v838_v26 }
 0x42d   :  { %v571_v28 = vpop.xlane.xlu1 %570 }
 0x42e   :  { %839 = vlog2.f32 %v571_v28 }
 0x431   :  { %v575_v31 = vpop.xlane.xlu1 %574  ;;  %v573_v32 = vpop.xlane.xlu0 %572 }
 0x432   :  { %841 = vlog2.f32 %v575_v31 }
 0x433   :  { %843 = vlog2.f32 %v573_v32 }
 0x435   :  { %v579_v30 = vpop.xlane.xlu1 %578 }
 0x436   :  { %v577_v33 = vpop.xlane.xlu0 %576  ;;  %845 = vlog2.f32 %v579_v30 }
 0x437   :  { %847 = vlog2.f32 %v577_v33 }
 0x438   :  { %v840_v34 = vpop.eup %839 }
 0x439   :  { %v581_v35 = vmul.f32 0.6931472, %v840_v34 }
 0x43b   :  { %v590_v36 = vsub.f32 %v555_v8, %v581_v35 }
 0x43c   :  { %v842_v37 = vpop.eup %841 }
 0x43d   :  { %v844_v38 = vpop.eup %843  ;;  %595 = vst [vmem:[#allocation8] sm:$0xff] %v590_v36  ;;  %v585_v39 = vmul.f32 0.6931472, %v842_v37 }
 0x43e   :  { %v583_v40 = vmul.f32 0.6931472, %v844_v38 }
 0x43f   :  { %v592_v41 = vsub.f32 %v557_v7, %v585_v39 }
 0x440   :  { %v846_v42 = vpop.eup %845  ;;  %v591_v43 = vsub.f32 %v556_v14, %v583_v40 }
 0x441   :  { %v848_v44 = vpop.eup %847  ;;  %597 = vst [vmem:[#allocation8 + $0x10] sm:$0xff] %v592_v41  ;;  %v589_v45 = vmul.f32 0.6931472, %v846_v42 }
 0x442   :  { %596 = vst [vmem:[#allocation8 + $0x8] sm:$0xff] %v591_v43  ;;  %v587_v46 = vmul.f32 0.6931472, %v848_v44 }
 0x443   :  { %v594_v47 = vsub.f32 %v559_v19, %v589_v45 }
 0x444   :  { %v593_v48 = vsub.f32 %v558_v15, %v587_v46 }
 0x445   :  { %599 = vst [vmem:[#allocation8 + $0x20] sm:$0xff] %v594_v47 }
 0x446   :  { %598 = vst [vmem:[#allocation8 + $0x18] sm:$0xff] %v593_v48 }
 0x447   :  { %926 = shalt.err (!%p923_p0)
}
 0x448   :  { %s927_s30 = scalar_lea.hbm %s1073_s4, 640 }
 0x449   :  { %p928_p1 = scmp.ne.s32.totalorder %s1073_s4, %s927_s30  ;;  %p931_p2 = scmp.lt.u32.totalorder %s927_s30, %s1073_s4 }
 0x44b   :  { %p933_p3 = pnand %p931_p2, %p928_p1 }
 0x44d   :  { %936 = shalt.err (!%p933_p3)
}
 0x44e   :  { %s951_s9 = smov 128   ;;  %s952_s10 = smov 8  }
 0x44f   :  { %611 = dma.vmem_to_hbm [thread:$0]  %s606_s26, 640, %s1073_s4, [#allocation4], %s951_s9, %s951_s9, %s952_s10  }
 0x450   :  { %941 = dma.done.wait [#allocation4], 640  }
 0x451   :  { %942 = vsyncadd [#allocation4], 4294966656 }
 0x452   :  { %615 = vsyncpa [#allocation3], 1 }
 0x453   :  { %616 = vsyncpa [#allocation6], 1 }
 0x454   :  { %617 = vsyncpa [#allocation4], 1 }

</bundles_post_ra>
